<compile_context>
chip_gen: v6e
topology: v6e:2x2x1
jax: 0.10.0
libtpu: 0.0.40
codegen_flags: <defaults>
</compile_context>

<pallas_src>
import functools

import jax
import jax.numpy as jnp
from jax import lax
from jax.experimental import pallas as pl
from jax.experimental.pallas import tpu as pltpu

INPUT_SIZE = 32
HIDDEN_SIZE = 100
OUTPUT_SIZE = 2
H_PAD = 128            # hidden padded to a full lane width
O_PAD = 128            # output padded to a full lane width (lane-dense writeback)

DROP_P = 0.1
KEEP_P = 1.0 - DROP_P
INV_KEEP = 1.0 / KEEP_P
KEEP_THRESH_INT = int(KEEP_P * (1 << 32))   # integer dropout threshold (uint32)
LEAKY_SLOPE = 0.01                          # torch nn.LeakyReLU default

_LAYER_SALTS = (0x85EBCA6B, 0xC2B2AE35, 0x27D4EB2F, 0x165667B1, 0x9E3779B9)


def _round_up(n, m):
    return ((n + m - 1) // m) * m


def _hash_u32(x):
    """splitmix-style uint32 finalizer (pure VPU integer ops)."""
    x = x ^ (x >> jnp.uint32(16))
    x = x * jnp.uint32(0x7FEB352D)
    x = x ^ (x >> jnp.uint32(15))
    x = x * jnp.uint32(0x846CA68B)
    x = x ^ (x >> jnp.uint32(16))
    return x


def mlp_kernel(seed_ref, x_ref,
               w1, b1, w2, b2, w3, b3, w4, b4, w5, b5, wo, bo,
               o_ref, *, apply_dropout):
    bb = x_ref.shape[0]                      # batch rows in this block (static)
    blk = pl.program_id(0)

    if apply_dropout:
        seed = seed_ref[0].astype(jnp.uint32)
        row = lax.broadcasted_iota(jnp.int32, (bb, H_PAD), 0).astype(jnp.uint32)
        col = lax.broadcasted_iota(jnp.int32, (bb, H_PAD), 1).astype(jnp.uint32)
        grow = row + (blk * bb).astype(jnp.uint32)      # global row index
        base = (grow * jnp.uint32(H_PAD) + col) ^ (seed * jnp.uint32(0x9E3779B1))
        thresh = jnp.uint32(KEEP_THRESH_INT)

    def hidden_layer(h, w_ref, b_ref, salt):
        y = jnp.dot(h.astype(jnp.bfloat16), w_ref[...],
                    preferred_element_type=jnp.float32) + b_ref[...]
        y = jnp.maximum(y, LEAKY_SLOPE * y)             # LeakyReLU
        if apply_dropout:                               # Dropout(p=0.1), train mode
            bits = _hash_u32(base + jnp.uint32(salt))
            y = jnp.where(bits < thresh, y * INV_KEEP, 0.0)
        return y

    h = x_ref[...]
    h = hidden_layer(h, w1, b1, _LAYER_SALTS[0])
    h = hidden_layer(h, w2, b2, _LAYER_SALTS[1])
    h = hidden_layer(h, w3, b3, _LAYER_SALTS[2])
    h = hidden_layer(h, w4, b4, _LAYER_SALTS[3])
    h = hidden_layer(h, w5, b5, _LAYER_SALTS[4])

    y = jnp.dot(h.astype(jnp.bfloat16), wo[...],
                preferred_element_type=jnp.float32) + bo[...]
    o_ref[...] = jnp.maximum(y, 0.0)                    # final ReLU


def ff_po_nsc_forward(x, packed_params, seed, *, apply_dropout=True, block_b=256):
    """x: (B, INPUT_SIZE) f32. packed_params: flat list from pack_params().
    seed: int. Returns (B, OUTPUT_SIZE) f32."""
    B = x.shape[0]
    x = x.astype(jnp.float32)

    bb = min(block_b, _round_up(max(B, 1), 8))          # batch block (sublane-aligned)
    Bp = _round_up(B, bb)
    if Bp != B:
        x = jnp.pad(x, ((0, Bp - B), (0, 0)))
    grid = (Bp // bb,)

    seed_arr = jnp.asarray([seed], dtype=jnp.int32)

    # x / out blocked along batch; weights/biases are whole arrays whose
    # index_map returns the same block every step -> stay VMEM resident.
    in_specs = [pl.BlockSpec((bb, INPUT_SIZE), lambda i, s: (i, 0))]
    for p in packed_params:
        in_specs.append(pl.BlockSpec(p.shape, lambda i, s: (0, 0)))
    out_spec = pl.BlockSpec((bb, O_PAD), lambda i, s: (i, 0))

    kernel = functools.partial(mlp_kernel, apply_dropout=apply_dropout)

    out = pl.pallas_call(
        kernel,
        out_shape=jax.ShapeDtypeStruct((Bp, O_PAD), jnp.float32),
        grid_spec=pltpu.PrefetchScalarGridSpec(
            num_scalar_prefetch=1,
            grid=grid,
            in_specs=in_specs,
            out_specs=out_spec,
        ),
        compiler_params=pltpu.CompilerParams(
            dimension_semantics=("parallel",)),
    )(seed_arr, x, *packed_params)

    return out[:B, :OUTPUT_SIZE]


def init_params(key):
    """Deterministic init mirroring nn.Linear (torch layout: W (out,in), b (out,))."""
    dims = [(HIDDEN_SIZE, INPUT_SIZE)] + [(HIDDEN_SIZE, HIDDEN_SIZE)] * 4 \
           + [(OUTPUT_SIZE, HIDDEN_SIZE)]
    params = []
    for (fan_out, fan_in) in dims:
        key, kw, kb = jax.random.split(key, 3)
        bound = 1.0 / (fan_in ** 0.5)
        w = jax.random.uniform(kw, (fan_out, fan_in), jnp.float32, -bound, bound)
        b = jax.random.uniform(kb, (fan_out,), jnp.float32, -bound, bound)
        params.append((w, b))
    return params


def pack_params(params):
    """Transpose to (in,out), zero-pad to lane-dense 128 widths, cast W to bf16."""
    in_pads = [INPUT_SIZE, H_PAD, H_PAD, H_PAD, H_PAD, H_PAD]
    out_pads = [H_PAD, H_PAD, H_PAD, H_PAD, H_PAD, O_PAD]
    flat = []
    for (w, b), ip, op in zip(params, in_pads, out_pads):
        wt = w.T                                              # (in, out)
        wt = jnp.pad(wt, ((0, ip - wt.shape[0]), (0, op - wt.shape[1])))
        bp = jnp.pad(b, (0, op - b.shape[0])).reshape(1, -1)
        flat.append(wt.astype(jnp.bfloat16))
        flat.append(bp.astype(jnp.float32))
    return flat


if __name__ == "__main__":
    key = jax.random.PRNGKey(0)
    key_x, key_p = jax.random.split(key)

    batch = 8
    x = jax.random.normal(key_x, (batch, INPUT_SIZE), dtype=jnp.float32)
    params = init_params(key_p)
    packed = pack_params(params)

    out = ff_po_nsc_forward(x, packed, seed=0)
    out = jax.block_until_ready(out)

    assert out.shape == (batch, OUTPUT_SIZE), out.shape
    assert bool(jnp.all(out >= 0.0)), "final ReLU violated"
    assert bool(jnp.all(jnp.isfinite(out))), "non-finite output"
    print("KERNEL_OK")
</pallas_src>

<mosaic_0001>
module attributes {stable_mosaic.version = 11 : i64} {
  func.func @mlp_kernel(%arg0: i32, %arg1: memref<1xi32, #tpu.memory_space<smem>>, %arg2: memref<8x32xf32, #tpu.memory_space<vmem>>, %arg3: memref<32x128xbf16, #tpu.memory_space<vmem>>, %arg4: memref<1x128xf32, #tpu.memory_space<vmem>>, %arg5: memref<128x128xbf16, #tpu.memory_space<vmem>>, %arg6: memref<1x128xf32, #tpu.memory_space<vmem>>, %arg7: memref<128x128xbf16, #tpu.memory_space<vmem>>, %arg8: memref<1x128xf32, #tpu.memory_space<vmem>>, %arg9: memref<128x128xbf16, #tpu.memory_space<vmem>>, %arg10: memref<1x128xf32, #tpu.memory_space<vmem>>, %arg11: memref<128x128xbf16, #tpu.memory_space<vmem>>, %arg12: memref<1x128xf32, #tpu.memory_space<vmem>>, %arg13: memref<128x128xbf16, #tpu.memory_space<vmem>>, %arg14: memref<1x128xf32, #tpu.memory_space<vmem>>, %arg15: memref<8x128xf32, #tpu.memory_space<vmem>>) attributes {dimension_semantics = [#tpu.dimension_semantics<parallel>], iteration_bounds = array<i64: 1>, scalar_prefetch = 1 : i64, scratch_operands = 0 : i64, tpu.core_type = #tpu.core_type<tc>, window_params = [{transform_indices = @transform_0, window_bounds = array<i64: 8, 32>}, {pipeline_mode = #tpu.pipeline_mode<synchronous>, transform_indices = @transform_1, window_bounds = array<i64: 32, 128>}, {pipeline_mode = #tpu.pipeline_mode<synchronous>, transform_indices = @transform_2, window_bounds = array<i64: 1, 128>}, {pipeline_mode = #tpu.pipeline_mode<synchronous>, transform_indices = @transform_3, window_bounds = array<i64: 128, 128>}, {pipeline_mode = #tpu.pipeline_mode<synchronous>, transform_indices = @transform_4, window_bounds = array<i64: 1, 128>}, {pipeline_mode = #tpu.pipeline_mode<synchronous>, transform_indices = @transform_5, window_bounds = array<i64: 128, 128>}, {pipeline_mode = #tpu.pipeline_mode<synchronous>, transform_indices = @transform_6, window_bounds = array<i64: 1, 128>}, {pipeline_mode = #tpu.pipeline_mode<synchronous>, transform_indices = @transform_7, window_bounds = array<i64: 128, 128>}, {pipeline_mode = #tpu.pipeline_mode<synchronous>, transform_indices = @transform_8, window_bounds = array<i64: 1, 128>}, {pipeline_mode = #tpu.pipeline_mode<synchronous>, transform_indices = @transform_9, window_bounds = array<i64: 128, 128>}, {pipeline_mode = #tpu.pipeline_mode<synchronous>, transform_indices = @transform_10, window_bounds = array<i64: 1, 128>}, {pipeline_mode = #tpu.pipeline_mode<synchronous>, transform_indices = @transform_11, window_bounds = array<i64: 128, 128>}, {pipeline_mode = #tpu.pipeline_mode<synchronous>, transform_indices = @transform_12, window_bounds = array<i64: 1, 128>}, {transform_indices = @transform_13, window_bounds = array<i64: 8, 128>}]} {
    %c0 = arith.constant 0 : index
    %0 = memref.load %arg1[%c0] : memref<1xi32, #tpu.memory_space<smem>>
    %1 = tpu.iota {dimensions = array<i32: 0>} : vector<8x128xi32>
    %2 = tpu.iota {dimensions = array<i32: 1>} : vector<8x128xi32>
    %c8_i32 = arith.constant 8 : i32
    %3 = arith.muli %arg0, %c8_i32 : i32
    %4 = vector.broadcast %3 : i32 to vector<8x128xi32>
    %5 = arith.addi %1, %4 : vector<8x128xi32>
    %c128_i32 = arith.constant 128 : i32
    %6 = vector.broadcast %c128_i32 : i32 to vector<8x128xi32>
    %7 = arith.muli %5, %6 : vector<8x128xi32>
    %8 = arith.addi %7, %2 : vector<8x128xi32>
    %c-1640531535_i32 = arith.constant -1640531535 : i32
    %9 = arith.muli %0, %c-1640531535_i32 : i32
    %10 = vector.broadcast %9 : i32 to vector<8x128xi32>
    %11 = arith.xori %8, %10 : vector<8x128xi32>
    %c0_0 = arith.constant 0 : index
    %c0_1 = arith.constant 0 : index
    %12 = vector.load %arg2[%c0_0, %c0_1] : memref<8x32xf32, #tpu.memory_space<vmem>>, vector<8x32xf32>
    %13 = arith.truncf %12 : vector<8x32xf32> to vector<8x32xbf16>
    %c0_2 = arith.constant 0 : index
    %c0_3 = arith.constant 0 : index
    %14 = vector.load %arg3[%c0_2, %c0_3] : memref<32x128xbf16, #tpu.memory_space<vmem>>, vector<32x128xbf16>
    %cst = arith.constant dense<0.000000e+00> : vector<8x128xf32>
    %15 = tpu.matmul %13, %14, %cst {dimension_numbers = #tpu.dot_dimension_numbers<[1], [0], [0], [1], [0, 0, 1, 1], [], []>} : vector<8x32xbf16>, vector<32x128xbf16>, vector<8x128xf32> -> vector<8x128xf32>
    %c0_4 = arith.constant 0 : index
    %c0_5 = arith.constant 0 : index
    %16 = vector.load %arg4[%c0_4, %c0_5] : memref<1x128xf32, #tpu.memory_space<vmem>>, vector<1x128xf32>
    %17 = vector.broadcast %16 : vector<1x128xf32> to vector<8x128xf32>
    %18 = arith.addf %15, %17 : vector<8x128xf32>
    %cst_6 = arith.constant 0.00999999977 : f32
    %19 = vector.broadcast %cst_6 : f32 to vector<8x128xf32>
    %20 = arith.mulf %19, %18 : vector<8x128xf32>
    %21 = arith.maximumf %18, %20 : vector<8x128xf32>
    %c-2048144789_i32 = arith.constant -2048144789 : i32
    %22 = vector.broadcast %c-2048144789_i32 : i32 to vector<8x128xi32>
    %23 = arith.addi %11, %22 : vector<8x128xi32>
    %c16_i32 = arith.constant 16 : i32
    %24 = vector.broadcast %c16_i32 : i32 to vector<8x128xi32>
    %25 = arith.shrui %23, %24 : vector<8x128xi32>
    %26 = arith.xori %23, %25 : vector<8x128xi32>
    %c2146121005_i32 = arith.constant 2146121005 : i32
    %27 = vector.broadcast %c2146121005_i32 : i32 to vector<8x128xi32>
    %28 = arith.muli %26, %27 : vector<8x128xi32>
    %c15_i32 = arith.constant 15 : i32
    %29 = vector.broadcast %c15_i32 : i32 to vector<8x128xi32>
    %30 = arith.shrui %28, %29 : vector<8x128xi32>
    %31 = arith.xori %28, %30 : vector<8x128xi32>
    %c-2073254261_i32 = arith.constant -2073254261 : i32
    %32 = vector.broadcast %c-2073254261_i32 : i32 to vector<8x128xi32>
    %33 = arith.muli %31, %32 : vector<8x128xi32>
    %c16_i32_7 = arith.constant 16 : i32
    %34 = vector.broadcast %c16_i32_7 : i32 to vector<8x128xi32>
    %35 = arith.shrui %33, %34 : vector<8x128xi32>
    %36 = arith.xori %33, %35 : vector<8x128xi32>
    %c-429496730_i32 = arith.constant -429496730 : i32
    %37 = vector.broadcast %c-429496730_i32 : i32 to vector<8x128xi32>
    %38 = arith.cmpi ult, %36, %37 : vector<8x128xi32>
    %cst_8 = arith.constant 1.11111116 : f32
    %39 = vector.broadcast %cst_8 : f32 to vector<8x128xf32>
    %40 = arith.mulf %21, %39 : vector<8x128xf32>
    %cst_9 = arith.constant 0.000000e+00 : f32
    %41 = vector.broadcast %cst_9 : f32 to vector<8x128xf32>
    %42 = arith.select %38, %40, %41 : vector<8x128xi1>, vector<8x128xf32>
    %43 = arith.truncf %42 : vector<8x128xf32> to vector<8x128xbf16>
    %c0_10 = arith.constant 0 : index
    %c0_11 = arith.constant 0 : index
    %44 = vector.load %arg5[%c0_10, %c0_11] : memref<128x128xbf16, #tpu.memory_space<vmem>>, vector<128x128xbf16>
    %cst_12 = arith.constant dense<0.000000e+00> : vector<8x128xf32>
    %45 = tpu.matmul %43, %44, %cst_12 {dimension_numbers = #tpu.dot_dimension_numbers<[1], [0], [0], [1], [0, 0, 1, 1], [], []>} : vector<8x128xbf16>, vector<128x128xbf16>, vector<8x128xf32> -> vector<8x128xf32>
    %c0_13 = arith.constant 0 : index
    %c0_14 = arith.constant 0 : index
    %46 = vector.load %arg6[%c0_13, %c0_14] : memref<1x128xf32, #tpu.memory_space<vmem>>, vector<1x128xf32>
    %47 = vector.broadcast %46 : vector<1x128xf32> to vector<8x128xf32>
    %48 = arith.addf %45, %47 : vector<8x128xf32>
    %cst_15 = arith.constant 0.00999999977 : f32
    %49 = vector.broadcast %cst_15 : f32 to vector<8x128xf32>
    %50 = arith.mulf %49, %48 : vector<8x128xf32>
    %51 = arith.maximumf %48, %50 : vector<8x128xf32>
    %c-1028477387_i32 = arith.constant -1028477387 : i32
    %52 = vector.broadcast %c-1028477387_i32 : i32 to vector<8x128xi32>
    %53 = arith.addi %11, %52 : vector<8x128xi32>
    %c16_i32_16 = arith.constant 16 : i32
    %54 = vector.broadcast %c16_i32_16 : i32 to vector<8x128xi32>
    %55 = arith.shrui %53, %54 : vector<8x128xi32>
    %56 = arith.xori %53, %55 : vector<8x128xi32>
    %c2146121005_i32_17 = arith.constant 2146121005 : i32
    %57 = vector.broadcast %c2146121005_i32_17 : i32 to vector<8x128xi32>
    %58 = arith.muli %56, %57 : vector<8x128xi32>
    %c15_i32_18 = arith.constant 15 : i32
    %59 = vector.broadcast %c15_i32_18 : i32 to vector<8x128xi32>
    %60 = arith.shrui %58, %59 : vector<8x128xi32>
    %61 = arith.xori %58, %60 : vector<8x128xi32>
    %c-2073254261_i32_19 = arith.constant -2073254261 : i32
    %62 = vector.broadcast %c-2073254261_i32_19 : i32 to vector<8x128xi32>
    %63 = arith.muli %61, %62 : vector<8x128xi32>
    %c16_i32_20 = arith.constant 16 : i32
    %64 = vector.broadcast %c16_i32_20 : i32 to vector<8x128xi32>
    %65 = arith.shrui %63, %64 : vector<8x128xi32>
    %66 = arith.xori %63, %65 : vector<8x128xi32>
    %c-429496730_i32_21 = arith.constant -429496730 : i32
    %67 = vector.broadcast %c-429496730_i32_21 : i32 to vector<8x128xi32>
    %68 = arith.cmpi ult, %66, %67 : vector<8x128xi32>
    %cst_22 = arith.constant 1.11111116 : f32
    %69 = vector.broadcast %cst_22 : f32 to vector<8x128xf32>
    %70 = arith.mulf %51, %69 : vector<8x128xf32>
    %cst_23 = arith.constant 0.000000e+00 : f32
    %71 = vector.broadcast %cst_23 : f32 to vector<8x128xf32>
    %72 = arith.select %68, %70, %71 : vector<8x128xi1>, vector<8x128xf32>
    %73 = arith.truncf %72 : vector<8x128xf32> to vector<8x128xbf16>
    %c0_24 = arith.constant 0 : index
    %c0_25 = arith.constant 0 : index
    %74 = vector.load %arg7[%c0_24, %c0_25] : memref<128x128xbf16, #tpu.memory_space<vmem>>, vector<128x128xbf16>
    %cst_26 = arith.constant dense<0.000000e+00> : vector<8x128xf32>
    %75 = tpu.matmul %73, %74, %cst_26 {dimension_numbers = #tpu.dot_dimension_numbers<[1], [0], [0], [1], [0, 0, 1, 1], [], []>} : vector<8x128xbf16>, vector<128x128xbf16>, vector<8x128xf32> -> vector<8x128xf32>
    %c0_27 = arith.constant 0 : index
    %c0_28 = arith.constant 0 : index
    %76 = vector.load %arg8[%c0_27, %c0_28] : memref<1x128xf32, #tpu.memory_space<vmem>>, vector<1x128xf32>
    %77 = vector.broadcast %76 : vector<1x128xf32> to vector<8x128xf32>
    %78 = arith.addf %75, %77 : vector<8x128xf32>
    %cst_29 = arith.constant 0.00999999977 : f32
    %79 = vector.broadcast %cst_29 : f32 to vector<8x128xf32>
    %80 = arith.mulf %79, %78 : vector<8x128xf32>
    %81 = arith.maximumf %78, %80 : vector<8x128xf32>
    %c668265263_i32 = arith.constant 668265263 : i32
    %82 = vector.broadcast %c668265263_i32 : i32 to vector<8x128xi32>
    %83 = arith.addi %11, %82 : vector<8x128xi32>
    %c16_i32_30 = arith.constant 16 : i32
    %84 = vector.broadcast %c16_i32_30 : i32 to vector<8x128xi32>
    %85 = arith.shrui %83, %84 : vector<8x128xi32>
    %86 = arith.xori %83, %85 : vector<8x128xi32>
    %c2146121005_i32_31 = arith.constant 2146121005 : i32
    %87 = vector.broadcast %c2146121005_i32_31 : i32 to vector<8x128xi32>
    %88 = arith.muli %86, %87 : vector<8x128xi32>
    %c15_i32_32 = arith.constant 15 : i32
    %89 = vector.broadcast %c15_i32_32 : i32 to vector<8x128xi32>
    %90 = arith.shrui %88, %89 : vector<8x128xi32>
    %91 = arith.xori %88, %90 : vector<8x128xi32>
    %c-2073254261_i32_33 = arith.constant -2073254261 : i32
    %92 = vector.broadcast %c-2073254261_i32_33 : i32 to vector<8x128xi32>
    %93 = arith.muli %91, %92 : vector<8x128xi32>
    %c16_i32_34 = arith.constant 16 : i32
    %94 = vector.broadcast %c16_i32_34 : i32 to vector<8x128xi32>
    %95 = arith.shrui %93, %94 : vector<8x128xi32>
    %96 = arith.xori %93, %95 : vector<8x128xi32>
    %c-429496730_i32_35 = arith.constant -429496730 : i32
    %97 = vector.broadcast %c-429496730_i32_35 : i32 to vector<8x128xi32>
    %98 = arith.cmpi ult, %96, %97 : vector<8x128xi32>
    %cst_36 = arith.constant 1.11111116 : f32
    %99 = vector.broadcast %cst_36 : f32 to vector<8x128xf32>
    %100 = arith.mulf %81, %99 : vector<8x128xf32>
    %cst_37 = arith.constant 0.000000e+00 : f32
    %101 = vector.broadcast %cst_37 : f32 to vector<8x128xf32>
    %102 = arith.select %98, %100, %101 : vector<8x128xi1>, vector<8x128xf32>
    %103 = arith.truncf %102 : vector<8x128xf32> to vector<8x128xbf16>
    %c0_38 = arith.constant 0 : index
    %c0_39 = arith.constant 0 : index
    %104 = vector.load %arg9[%c0_38, %c0_39] : memref<128x128xbf16, #tpu.memory_space<vmem>>, vector<128x128xbf16>
    %cst_40 = arith.constant dense<0.000000e+00> : vector<8x128xf32>
    %105 = tpu.matmul %103, %104, %cst_40 {dimension_numbers = #tpu.dot_dimension_numbers<[1], [0], [0], [1], [0, 0, 1, 1], [], []>} : vector<8x128xbf16>, vector<128x128xbf16>, vector<8x128xf32> -> vector<8x128xf32>
    %c0_41 = arith.constant 0 : index
    %c0_42 = arith.constant 0 : index
    %106 = vector.load %arg10[%c0_41, %c0_42] : memref<1x128xf32, #tpu.memory_space<vmem>>, vector<1x128xf32>
    %107 = vector.broadcast %106 : vector<1x128xf32> to vector<8x128xf32>
    %108 = arith.addf %105, %107 : vector<8x128xf32>
    %cst_43 = arith.constant 0.00999999977 : f32
    %109 = vector.broadcast %cst_43 : f32 to vector<8x128xf32>
    %110 = arith.mulf %109, %108 : vector<8x128xf32>
    %111 = arith.maximumf %108, %110 : vector<8x128xf32>
    %c374761393_i32 = arith.constant 374761393 : i32
    %112 = vector.broadcast %c374761393_i32 : i32 to vector<8x128xi32>
    %113 = arith.addi %11, %112 : vector<8x128xi32>
    %c16_i32_44 = arith.constant 16 : i32
    %114 = vector.broadcast %c16_i32_44 : i32 to vector<8x128xi32>
    %115 = arith.shrui %113, %114 : vector<8x128xi32>
    %116 = arith.xori %113, %115 : vector<8x128xi32>
    %c2146121005_i32_45 = arith.constant 2146121005 : i32
    %117 = vector.broadcast %c2146121005_i32_45 : i32 to vector<8x128xi32>
    %118 = arith.muli %116, %117 : vector<8x128xi32>
    %c15_i32_46 = arith.constant 15 : i32
    %119 = vector.broadcast %c15_i32_46 : i32 to vector<8x128xi32>
    %120 = arith.shrui %118, %119 : vector<8x128xi32>
    %121 = arith.xori %118, %120 : vector<8x128xi32>
    %c-2073254261_i32_47 = arith.constant -2073254261 : i32
    %122 = vector.broadcast %c-2073254261_i32_47 : i32 to vector<8x128xi32>
    %123 = arith.muli %121, %122 : vector<8x128xi32>
    %c16_i32_48 = arith.constant 16 : i32
    %124 = vector.broadcast %c16_i32_48 : i32 to vector<8x128xi32>
    %125 = arith.shrui %123, %124 : vector<8x128xi32>
    %126 = arith.xori %123, %125 : vector<8x128xi32>
    %c-429496730_i32_49 = arith.constant -429496730 : i32
    %127 = vector.broadcast %c-429496730_i32_49 : i32 to vector<8x128xi32>
    %128 = arith.cmpi ult, %126, %127 : vector<8x128xi32>
    %cst_50 = arith.constant 1.11111116 : f32
    %129 = vector.broadcast %cst_50 : f32 to vector<8x128xf32>
    %130 = arith.mulf %111, %129 : vector<8x128xf32>
    %cst_51 = arith.constant 0.000000e+00 : f32
    %131 = vector.broadcast %cst_51 : f32 to vector<8x128xf32>
    %132 = arith.select %128, %130, %131 : vector<8x128xi1>, vector<8x128xf32>
    %133 = arith.truncf %132 : vector<8x128xf32> to vector<8x128xbf16>
    %c0_52 = arith.constant 0 : index
    %c0_53 = arith.constant 0 : index
    %134 = vector.load %arg11[%c0_52, %c0_53] : memref<128x128xbf16, #tpu.memory_space<vmem>>, vector<128x128xbf16>
    %cst_54 = arith.constant dense<0.000000e+00> : vector<8x128xf32>
    %135 = tpu.matmul %133, %134, %cst_54 {dimension_numbers = #tpu.dot_dimension_numbers<[1], [0], [0], [1], [0, 0, 1, 1], [], []>} : vector<8x128xbf16>, vector<128x128xbf16>, vector<8x128xf32> -> vector<8x128xf32>
    %c0_55 = arith.constant 0 : index
    %c0_56 = arith.constant 0 : index
    %136 = vector.load %arg12[%c0_55, %c0_56] : memref<1x128xf32, #tpu.memory_space<vmem>>, vector<1x128xf32>
    %137 = vector.broadcast %136 : vector<1x128xf32> to vector<8x128xf32>
    %138 = arith.addf %135, %137 : vector<8x128xf32>
    %cst_57 = arith.constant 0.00999999977 : f32
    %139 = vector.broadcast %cst_57 : f32 to vector<8x128xf32>
    %140 = arith.mulf %139, %138 : vector<8x128xf32>
    %141 = arith.maximumf %138, %140 : vector<8x128xf32>
    %c-1640531527_i32 = arith.constant -1640531527 : i32
    %142 = vector.broadcast %c-1640531527_i32 : i32 to vector<8x128xi32>
    %143 = arith.addi %11, %142 : vector<8x128xi32>
    %c16_i32_58 = arith.constant 16 : i32
    %144 = vector.broadcast %c16_i32_58 : i32 to vector<8x128xi32>
    %145 = arith.shrui %143, %144 : vector<8x128xi32>
    %146 = arith.xori %143, %145 : vector<8x128xi32>
    %c2146121005_i32_59 = arith.constant 2146121005 : i32
    %147 = vector.broadcast %c2146121005_i32_59 : i32 to vector<8x128xi32>
    %148 = arith.muli %146, %147 : vector<8x128xi32>
    %c15_i32_60 = arith.constant 15 : i32
    %149 = vector.broadcast %c15_i32_60 : i32 to vector<8x128xi32>
    %150 = arith.shrui %148, %149 : vector<8x128xi32>
    %151 = arith.xori %148, %150 : vector<8x128xi32>
    %c-2073254261_i32_61 = arith.constant -2073254261 : i32
    %152 = vector.broadcast %c-2073254261_i32_61 : i32 to vector<8x128xi32>
    %153 = arith.muli %151, %152 : vector<8x128xi32>
    %c16_i32_62 = arith.constant 16 : i32
    %154 = vector.broadcast %c16_i32_62 : i32 to vector<8x128xi32>
    %155 = arith.shrui %153, %154 : vector<8x128xi32>
    %156 = arith.xori %153, %155 : vector<8x128xi32>
    %c-429496730_i32_63 = arith.constant -429496730 : i32
    %157 = vector.broadcast %c-429496730_i32_63 : i32 to vector<8x128xi32>
    %158 = arith.cmpi ult, %156, %157 : vector<8x128xi32>
    %cst_64 = arith.constant 1.11111116 : f32
    %159 = vector.broadcast %cst_64 : f32 to vector<8x128xf32>
    %160 = arith.mulf %141, %159 : vector<8x128xf32>
    %cst_65 = arith.constant 0.000000e+00 : f32
    %161 = vector.broadcast %cst_65 : f32 to vector<8x128xf32>
    %162 = arith.select %158, %160, %161 : vector<8x128xi1>, vector<8x128xf32>
    %163 = arith.truncf %162 : vector<8x128xf32> to vector<8x128xbf16>
    %c0_66 = arith.constant 0 : index
    %c0_67 = arith.constant 0 : index
    %164 = vector.load %arg13[%c0_66, %c0_67] : memref<128x128xbf16, #tpu.memory_space<vmem>>, vector<128x128xbf16>
    %cst_68 = arith.constant dense<0.000000e+00> : vector<8x128xf32>
    %165 = tpu.matmul %163, %164, %cst_68 {dimension_numbers = #tpu.dot_dimension_numbers<[1], [0], [0], [1], [0, 0, 1, 1], [], []>} : vector<8x128xbf16>, vector<128x128xbf16>, vector<8x128xf32> -> vector<8x128xf32>
    %c0_69 = arith.constant 0 : index
    %c0_70 = arith.constant 0 : index
    %166 = vector.load %arg14[%c0_69, %c0_70] : memref<1x128xf32, #tpu.memory_space<vmem>>, vector<1x128xf32>
    %167 = vector.broadcast %166 : vector<1x128xf32> to vector<8x128xf32>
    %168 = arith.addf %165, %167 : vector<8x128xf32>
    %cst_71 = arith.constant 0.000000e+00 : f32
    %169 = vector.broadcast %cst_71 : f32 to vector<8x128xf32>
    %170 = arith.maximumf %168, %169 : vector<8x128xf32>
    %c0_72 = arith.constant 0 : index
    %c0_73 = arith.constant 0 : index
    %171 = vector.load %arg15[%c0_72, %c0_73] : memref<8x128xf32, #tpu.memory_space<vmem>>, vector<8x128xf32>
    tpu.vector_store %arg15[%c0_72, %c0_73], %170 {strides = array<i32>} : memref<8x128xf32, #tpu.memory_space<vmem>>, vector<8x128xf32>,
    return
  }
  func.func @transform_0(%arg0: i32, %arg1: memref<1xi32, #tpu.memory_space<smem>>) -> (i32, i32) {
    %c0_i32 = arith.constant 0 : i32
    %c0_i32_0 = arith.constant 0 : i32
    return %arg0, %c0_i32 : i32, i32
  }
  func.func @transform_1(%arg0: i32, %arg1: memref<1xi32, #tpu.memory_space<smem>>) -> (i32, i32) {
    %c0_i32 = arith.constant 0 : i32
    %c0_i32_0 = arith.constant 0 : i32
    %c0_i32_1 = arith.constant 0 : i32
    return %c0_i32, %c0_i32_0 : i32, i32
  }
  func.func @transform_2(%arg0: i32, %arg1: memref<1xi32, #tpu.memory_space<smem>>) -> (i32, i32) {
    %c0_i32 = arith.constant 0 : i32
    %c0_i32_0 = arith.constant 0 : i32
    %c0_i32_1 = arith.constant 0 : i32
    return %c0_i32, %c0_i32_0 : i32, i32
  }
  func.func @transform_3(%arg0: i32, %arg1: memref<1xi32, #tpu.memory_space<smem>>) -> (i32, i32) {
    %c0_i32 = arith.constant 0 : i32
    %c0_i32_0 = arith.constant 0 : i32
    %c0_i32_1 = arith.constant 0 : i32
    return %c0_i32, %c0_i32_0 : i32, i32
  }
  func.func @transform_4(%arg0: i32, %arg1: memref<1xi32, #tpu.memory_space<smem>>) -> (i32, i32) {
    %c0_i32 = arith.constant 0 : i32
    %c0_i32_0 = arith.constant 0 : i32
    %c0_i32_1 = arith.constant 0 : i32
    return %c0_i32, %c0_i32_0 : i32, i32
  }
  func.func @transform_5(%arg0: i32, %arg1: memref<1xi32, #tpu.memory_space<smem>>) -> (i32, i32) {
    %c0_i32 = arith.constant 0 : i32
    %c0_i32_0 = arith.constant 0 : i32
    %c0_i32_1 = arith.constant 0 : i32
    return %c0_i32, %c0_i32_0 : i32, i32
  }
  func.func @transform_6(%arg0: i32, %arg1: memref<1xi32, #tpu.memory_space<smem>>) -> (i32, i32) {
    %c0_i32 = arith.constant 0 : i32
    %c0_i32_0 = arith.constant 0 : i32
    %c0_i32_1 = arith.constant 0 : i32
    return %c0_i32, %c0_i32_0 : i32, i32
  }
  func.func @transform_7(%arg0: i32, %arg1: memref<1xi32, #tpu.memory_space<smem>>) -> (i32, i32) {
    %c0_i32 = arith.constant 0 : i32
    %c0_i32_0 = arith.constant 0 : i32
    %c0_i32_1 = arith.constant 0 : i32
    return %c0_i32, %c0_i32_0 : i32, i32
  }
  func.func @transform_8(%arg0: i32, %arg1: memref<1xi32, #tpu.memory_space<smem>>) -> (i32, i32) {
    %c0_i32 = arith.constant 0 : i32
    %c0_i32_0 = arith.constant 0 : i32
    %c0_i32_1 = arith.constant 0 : i32
    return %c0_i32, %c0_i32_0 : i32, i32
  }
  func.func @transform_9(%arg0: i32, %arg1: memref<1xi32, #tpu.memory_space<smem>>) -> (i32, i32) {
    %c0_i32 = arith.constant 0 : i32
    %c0_i32_0 = arith.constant 0 : i32
    %c0_i32_1 = arith.constant 0 : i32
    return %c0_i32, %c0_i32_0 : i32, i32
  }
  func.func @transform_10(%arg0: i32, %arg1: memref<1xi32, #tpu.memory_space<smem>>) -> (i32, i32) {
    %c0_i32 = arith.constant 0 : i32
    %c0_i32_0 = arith.constant 0 : i32
    %c0_i32_1 = arith.constant 0 : i32
    return %c0_i32, %c0_i32_0 : i32, i32
  }
  func.func @transform_11(%arg0: i32, %arg1: memref<1xi32, #tpu.memory_space<smem>>) -> (i32, i32) {
    %c0_i32 = arith.constant 0 : i32
    %c0_i32_0 = arith.constant 0 : i32
    %c0_i32_1 = arith.constant 0 : i32
    return %c0_i32, %c0_i32_0 : i32, i32
  }
  func.func @transform_12(%arg0: i32, %arg1: memref<1xi32, #tpu.memory_space<smem>>) -> (i32, i32) {
    %c0_i32 = arith.constant 0 : i32
    %c0_i32_0 = arith.constant 0 : i32
    %c0_i32_1 = arith.constant 0 : i32
    return %c0_i32, %c0_i32_0 : i32, i32
  }
  func.func @transform_13(%arg0: i32, %arg1: memref<1xi32, #tpu.memory_space<smem>>) -> (i32, i32) {
    %c0_i32 = arith.constant 0 : i32
    %c0_i32_0 = arith.constant 0 : i32
    return %arg0, %c0_i32 : i32, i32
  }
}

</mosaic_0001>

<bundles_post_ra>
// kernel: tpu_custom_call.1
= control target key start
LH: loop header
LB: loop body
LE: loop exit
PB: predicated region body
PF: predicated region fallthrough
CT: control target
= control target key end

     0   :  { %20 = vsyncpa [#allocation5], 0  ;;  %s1528_s0 = inlined_call_operand.<no memory space> [shape: s32[1], index: 0, kind: input, shape index: {}]   ;;  %s1529_s1 = inlined_call_operand.hbm [shape: f32[8,32], index: 1, kind: input, shape index: {}]   ;;  %s1530_s2 = inlined_call_operand.hbm [shape: bf16[32,128], index: 2, kind: input, shape index: {}]   ;;  %s1531_s3 = inlined_call_operand.vmem [shape: f32[1,128], index: 3, kind: input, shape index: {}]   ;;  %s1532_s4 = inlined_call_operand.hbm [shape: bf16[128,128], index: 4, kind: input, shape index: {}]   ;;  %s1533_s5 = inlined_call_operand.vmem [shape: f32[1,128], index: 5, kind: input, shape index: {}]   ;;  %s1534_s6 = inlined_call_operand.hbm [shape: bf16[128,128], index: 6, kind: input, shape index: {}]   ;;  %s1535_s7 = inlined_call_operand.vmem [shape: f32[1,128], index: 7, kind: input, shape index: {}]   ;;  %s1536_s8 = inlined_call_operand.hbm [shape: bf16[128,128], index: 8, kind: input, shape index: {}]   ;;  %s1537_s9 = inlined_call_operand.vmem [shape: f32[1,128], index: 9, kind: input, shape index: {}]   ;;  %s1538_s10 = inlined_call_operand.hbm [shape: bf16[128,128], index: 10, kind: input, shape index: {}]   ;;  %s1539_s11 = inlined_call_operand.vmem [shape: f32[1,128], index: 11, kind: input, shape index: {}]   ;;  %s1540_s12 = inlined_call_operand.hbm [shape: bf16[128,128], index: 12, kind: input, shape index: {}]   ;;  %s1541_s13 = inlined_call_operand.vmem [shape: f32[1,128], index: 13, kind: input, shape index: {}]   ;;  %s1542_s14 = inlined_call_operand.hbm [shape: f32[8,128], index: 14, kind: output, shape index: {}]  }
   0x1   :  { %21 = vsyncpa [#allocation8], 0 }
   0x2   :  { %22 = vsyncpa [#allocation11], 0 }
   0x3   :  { %23 = vsyncpa [#allocation14], 0 }
   0x4   :  { %24 = vsyncpa [#allocation6], 0  ;;  %s1317_s29 = smov [#allocation7]  }
   0x5   :  { %s40_s30 = sshll.u32 %s1317_s29, 4  ;;  %s41_s30 = int_to_ptr.vmem [resolvable:$true] %s40_s30 }
   0x6   :  { %s1155_s15 = scalar_lea.vmem %s41_s30, 256  ;;  %p1160_p1 = scmp.lt.s32.totalorder %s41_s30, %s41_s30 }
   0x7   :  { %p1156_p0 = scmp.ne.s32.totalorder %s41_s30, %s1155_s15  ;;  %p1161_p2 = scmp.lt.s32.totalorder %s1155_s15, %s1155_s15 }
   0x9   :  { %p1162_p3 = por %p1161_p2, %p1160_p1 }
   0xb   :  { %p1163_p4 = pnand %p1162_p3, %p1156_p0 }
   0xd   :  { %1166 = shalt.err (!%p1163_p4)
}
   0xe   :  { %s1318_s16 = smov 64   ;;  %s1319_s17 = smov 4  }
   0xf   :  { %46 = dma.hbm_to_vmem [thread:$0]  %s1530_s2, 256, %s41_s30, [#allocation8], %s1318_s16, %s1318_s16, %s1319_s17  }
  0x10   :  { %s1320_s20 = smov [#allocation10]   ;;  %s1321_s22 = smov [#allocation13]  }
  0x11   :  { %s68_s21 = sshll.u32 %s1320_s20, 4  ;;  %s96_s23 = sshll.u32 %s1321_s22, 4  ;;  %s69_s21 = int_to_ptr.vmem [resolvable:$true] %s68_s21  ;;  %s97_s23 = int_to_ptr.vmem [resolvable:$true] %s96_s23 }
  0x12   :  { %s1175_s24 = scalar_lea.vmem %s69_s21, 1024  ;;  %p1180_p6 = scmp.lt.s32.totalorder %s69_s21, %s69_s21 }
  0x13   :  { %p1176_p5 = scmp.ne.s32.totalorder %s69_s21, %s1175_s24  ;;  %p1181_p7 = scmp.lt.s32.totalorder %s1175_s24, %s1175_s24 }
  0x15   :  { %p1182_p8 = por %p1181_p7, %p1180_p6 }
  0x17   :  { %p1183_p9 = pnand %p1182_p8, %p1176_p5 }
  0x19   :  { %1186 = shalt.err (!%p1183_p9)
}
  0x1a   :  { %74 = dma.hbm_to_vmem [thread:$0]  %s1534_s6, 1024, %s69_s21, [#allocation11], %s1318_s16, %s1318_s16, %s1319_s17  }
  0x1b   :  { %s1195_s2 = scalar_lea.vmem %s97_s23, 1024  ;;  %p1200_p11 = scmp.lt.s32.totalorder %s97_s23, %s97_s23 }
  0x1c   :  { %p1196_p10 = scmp.ne.s32.totalorder %s97_s23, %s1195_s2  ;;  %p1201_p12 = scmp.lt.s32.totalorder %s1195_s2, %s1195_s2 }
  0x1e   :  { %p1202_p13 = por %p1201_p12, %p1200_p11 }
  0x20   :  { %p1203_p0 = pnand %p1202_p13, %p1196_p10 }
  0x22   :  { %1206 = shalt.err (!%p1203_p0)
}
  0x23   :  { %102 = dma.hbm_to_vmem [thread:$0]  %s1538_s10, 1024, %s97_s23, [#allocation14], %s1318_s16, %s1318_s16, %s1319_s17  }
  0x24   :  { %s1322_s29 = smov [#allocation4]   ;;  %s1323_s15 = smov [#allocation9]  }
  0x25   :  { %s31_s30 = sshll.u32 %s1322_s29, 4  ;;  %s54_s6 = sshll.u32 %s1323_s15, 4  ;;  %s32_s30 = int_to_ptr.vmem [resolvable:$true] %s31_s30  ;;  %s55_s6 = int_to_ptr.vmem [resolvable:$true] %s54_s6 }
  0x26   :  { %s1215_s18 = scalar_lea.vmem %s32_s30, 128  ;;  %p1220_p2 = scmp.lt.s32.totalorder %s32_s30, %s32_s30 }
  0x27   :  { %p1216_p1 = scmp.ne.s32.totalorder %s32_s30, %s1215_s18  ;;  %p1221_p3 = scmp.lt.s32.totalorder %s1215_s18, %s1215_s18 }
  0x29   :  { %p1222_p4 = por %p1221_p3, %p1220_p2 }
  0x2b   :  { %p1223_p5 = pnand %p1222_p4, %p1216_p1 }
  0x2d   :  { %1226 = shalt.err (!%p1223_p5)
}
  0x2e   :  { %34 = dma.hbm_to_vmem [thread:$0]  %s1529_s1, 128, %s32_s30, [#allocation5]  }
  0x2f   :  { %s1235_s21 = scalar_lea.vmem %s55_s6, 1024  ;;  %p1240_p7 = scmp.lt.s32.totalorder %s55_s6, %s55_s6 }
  0x30   :  { %p1236_p6 = scmp.ne.s32.totalorder %s55_s6, %s1235_s21  ;;  %p1241_p8 = scmp.lt.s32.totalorder %s1235_s21, %s1235_s21 }
  0x32   :  { %p1242_p9 = por %p1241_p8, %p1240_p7 }
  0x34   :  { %p1243_p10 = pnand %p1242_p9, %p1236_p6 }
  0x36   :  { %1246 = shalt.err (!%p1243_p10)
}
  0x37   :  { %60 = dma.hbm_to_vmem [thread:$0]  %s1532_s4, 1024, %s55_s6, [#allocation8], %s1318_s16, %s1318_s16, %s1319_s17  }
  0x38   :  { %s1324_s23 = smov [#allocation12]   ;;  %s1325_s25 = smov [#allocation15]  }
  0x39   :  { %s82_s24 = sshll.u32 %s1324_s23, 4  ;;  %s110_s1 = sshll.u32 %s1325_s25, 4  ;;  %s83_s24 = int_to_ptr.vmem [resolvable:$true] %s82_s24  ;;  %s111_s1 = int_to_ptr.vmem [resolvable:$true] %s110_s1 }
  0x3a   :  { %s1255_s26 = scalar_lea.vmem %s83_s24, 1024  ;;  %p1260_p12 = scmp.lt.s32.totalorder %s83_s24, %s83_s24 }
  0x3b   :  { %p1256_p11 = scmp.ne.s32.totalorder %s83_s24, %s1255_s26  ;;  %p1261_p13 = scmp.lt.s32.totalorder %s1255_s26, %s1255_s26 }
  0x3d   :  { %p1262_p0 = por %p1261_p13, %p1260_p12 }
  0x3f   :  { %p1263_p1 = pnand %p1262_p0, %p1256_p11 }
  0x41   :  { %1266 = shalt.err (!%p1263_p1)
}
  0x42   :  { %88 = dma.hbm_to_vmem [thread:$0]  %s1536_s8, 1024, %s83_s24, [#allocation11], %s1318_s16, %s1318_s16, %s1319_s17  }
  0x43   :  { %s1275_s4 = scalar_lea.vmem %s111_s1, 1024  ;;  %p1280_p3 = scmp.lt.s32.totalorder %s111_s1, %s111_s1 }
  0x44   :  { %p1276_p2 = scmp.ne.s32.totalorder %s111_s1, %s1275_s4  ;;  %p1281_p4 = scmp.lt.s32.totalorder %s1275_s4, %s1275_s4 }
  0x46   :  { %p1282_p5 = por %p1281_p4, %p1280_p3 }
  0x48   :  { %p1283_p6 = pnand %p1282_p5, %p1276_p2 }
  0x4a   :  { %1286 = shalt.err (!%p1283_p6)
}
  0x4b   :  { %116 = dma.hbm_to_vmem [thread:$0]  %s1540_s12, 1024, %s111_s1, [#allocation14], %s1318_s16, %s1318_s16, %s1319_s17  }
  0x4c   :  { %1307 = dma.done.wait [#allocation5], 128  }
  0x4d   :  { %1308 = vsyncadd [#allocation5], 4294967168 }
  0x4e   :  { %1309 = dma.done.wait [#allocation8], 1280  }
  0x4f   :  { %1310 = vsyncadd [#allocation8], 4294966016 }
  0x50   :  { %1311 = dma.done.wait [#allocation11], 2048  }
  0x51   :  { %1312 = vsyncadd [#allocation11], 4294965248 }
  0x52   :  { %1313 = dma.done.wait [#allocation14], 2048  }
  0x53   :  { %1314 = vsyncadd [#allocation14], 4294965248  ;;  %v1326_v0 = vmov 0.0   ;;  %vm1327_vm0 = vmmov 0   ;;  %v1105_v1 = vld [vmem:[#allocation7 + $0x8] sm:$0xff]   ;;  %v1106_v2 = vld [vmem:[#allocation7] sm:$0xff]   ;;  %v142_v18 = vlaneseq }
  0x54   :  { %985 = vmatprep.subr.bf16.mxu0 %v1326_v0  ;;  %989 = vmatprep.mubr.msk.bf16.mxu0 %vm1327_vm0, %v1326_v0  ;;  %v154_v3 = vld [vmem:[#allocation4] sm:$0xff]  ;;  %v1107_v4 = vld [vmem:[#allocation9 + $0x38] sm:$0xff]   ;;  %v1108_v6 = vld [vmem:[#allocation9 + $0x30] sm:$0xff]   ;;  %vm179_vm1 = vcmask 261120   ;;  %s151_s16 = smul.u32 2654435761, %s1528_s0 }
  0x55   :  { %993 = vmatprep.subr.bf16.mxu1 %v1326_v0  ;;  %1009 = vmatprep.mubr.msk.bf16.mxu1 %vm1327_vm0, %v1326_v0  ;;  %v155_v5 = vpack.c.bf16 %v154_v3, %v154_v3  ;;  %v1109_v7 = vld [vmem:[#allocation9 + $0x28] sm:$0xff]   ;;  %v1110_v8 = vld [vmem:[#allocation9 + $0x20] sm:$0xff]   ;;  %v1111_v9 = vld [vmem:[#allocation9 + $0x18] sm:$0xff]   ;;  %v143_v19 = vshrl.u32 %v142_v18, 7  ;;  %v145_v20 = vand.u32 127, %v142_v18  ;;  %s1328_s21 = smov [#allocation16]  }
  0x56   :  { %986 = vmatpush3.bf16.msra.mxu0 %v1105_v1  ;;  %994 = vmatpush3.bf16.msra.mxu1 %v1107_v4  ;;  %v1112_v10 = vld [vmem:[#allocation9 + $0x10] sm:$0xff]   ;;  %v1113_v11 = vld [vmem:[#allocation9 + $0x8] sm:$0xff]   ;;  %v1114_v12 = vld [vmem:[#allocation9] sm:$0xff]   ;;  %v152_v23 = vstv %s151_s16 }
  0x57   :  { %987 = vmatprep.subr.bf16.mxu0 %v1326_v0  ;;  %995 = vmatprep.subr.bf16.mxu1 %v1326_v0  ;;  %v1115_v13 = vld [vmem:[#allocation10 + $0x38] sm:$0xff]   ;;  %v1116_v14 = vld [vmem:[#allocation10 + $0x30] sm:$0xff]   ;;  %v1117_v15 = vld [vmem:[#allocation10 + $0x28] sm:$0xff]   ;;  %v149_v21 = vmul.u32 128, %v143_v19 }
  0x58   :  { %v1118_v16 = vld [vmem:[#allocation10 + $0x20] sm:$0xff]   ;;  %v1119_v17 = vld [vmem:[#allocation10 + $0x18] sm:$0xff]   ;;  %v873_v33 = vld [vmem:[%s1531_s3] ss:$0 sm:$0xff] }
  0x59   :  { %v150_v22 = vadd.s32 %v149_v21, %v145_v20  ;;  %v1120_v44 = vld [vmem:[#allocation10 + $0x10] sm:$0xff]   ;;  %v1121_v45 = vld [vmem:[#allocation10 + $0x8] sm:$0xff]   ;;  %v1122_v46 = vld [vmem:[#allocation10] sm:$0xff]  }
  0x5a   :  { %988 = vmatpush3.bf16.msra.mxu0 %v1106_v2  ;;  %996 = vmatpush3.bf16.msra.mxu1 %v1108_v6  ;;  %v1123_v47 = vld [vmem:[#allocation12 + $0x38] sm:$0xff]   ;;  %v1124_v48 = vld [vmem:[#allocation12 + $0x30] sm:$0xff]   ;;  %v1125_v49 = vld [vmem:[#allocation12 + $0x28] sm:$0xff]  }
  0x5b   :  { %1013 = vmatprep.subr.bf16.mxu0 %v1326_v0  ;;  %997 = vmatprep.subr.bf16.mxu1 %v1326_v0  ;;  %v1469_v24 = vxor.u32 %v152_v23, %v150_v22  ;;  %v1126_v50 = vld [vmem:[#allocation12 + $0x20] sm:$0xff]   ;;  %v1127_v51 = vld [vmem:[#allocation12 + $0x18] sm:$0xff]   ;;  %v877_v60 = vld [vmem:[%s1533_s5] ss:$0 sm:$0xff] }
  0x5d   :  { %990 = vmatmul.mubr.msk.bf16.vlgmr.msra.gmra.mxu0 %vm179_vm1, %v155_v5  ;;  %v225_v25 = vadd.s32 2246822507, %v1469_v24  ;;  %v351_v52 = vadd.s32 3266489909, %v1469_v24 }
  0x5e   :  { %1029 = vmatprep.mubr.msk.bf16.mxu0 %vm1327_vm0, %v1326_v0  ;;  %998 = vmatpush3.bf16.msra.mxu1 %v1109_v7 }
  0x5f   :  { %999 = vmatprep.subr.bf16.mxu1 %v1326_v0  ;;  %1014 = vmatpush3.bf16.msra.mxu0 %v1115_v13  ;;  %v226_v26 = vshrl.u32 %v225_v25, 16  ;;  %v352_v53 = vshrl.u32 %v351_v52, 16  ;;  %v1133_v13 = vld [vmem:[#allocation13 + $0x28] sm:$0xff]  }
  0x60   :  { %1015 = vmatprep.subr.bf16.mxu0 %v1326_v0 }
  0x61   :  { %v227_v27 = vxor.u32 %v226_v26, %v225_v25  ;;  %v353_v54 = vxor.u32 %v352_v53, %v351_v52  ;;  %v889_v25 = vld [vmem:[%s1535_s7] ss:$0 sm:$0xff] }
  0x62   :  { %1000 = vmatpush3.bf16.msra.mxu1 %v1110_v8  ;;  %v1128_v8 = vld [vmem:[#allocation12 + $0x10] sm:$0xff]   ;;  %v901_v52 = vld [vmem:[%s1537_s9] ss:$0 sm:$0xff] }
  0x63   :  { %1001 = vmatprep.subr.bf16.mxu1 %v1326_v0  ;;  %1016 = vmatpush3.bf16.msra.mxu0 %v1116_v14  ;;  %v228_v28 = vmul.u32 2146121005, %v227_v27  ;;  %v354_v55 = vmul.u32 2146121005, %v353_v54  ;;  %v1134_v14 = vld [vmem:[#allocation13 + $0x20] sm:$0xff]  }
  0x64   :  { %1017 = vmatprep.subr.bf16.mxu0 %v1326_v0 }
  0x65   :  { %v229_v29 = vshrl.u32 %v228_v28, 15  ;;  %v355_v56 = vshrl.u32 %v354_v55, 15 }
  0x66   :  { %1002 = vmatpush3.bf16.msra.mxu1 %v1111_v9  ;;  %v1129_v9 = vld [vmem:[#allocation12 + $0x8] sm:$0xff]  }
  0x67   :  { %1003 = vmatprep.subr.bf16.mxu1 %v1326_v0  ;;  %1018 = vmatpush3.bf16.msra.mxu0 %v1117_v15  ;;  %v230_v30 = vxor.u32 %v229_v29, %v228_v28  ;;  %v356_v57 = vxor.u32 %v355_v56, %v354_v55  ;;  %v1135_v15 = vld [vmem:[#allocation13 + $0x18] sm:$0xff]  }
  0x68   :  { %1019 = vmatprep.subr.bf16.mxu0 %v1326_v0 }
  0x69   :  { %v231_v31 = vmul.u32 2221713035, %v230_v30  ;;  %v357_v58 = vmul.u32 2221713035, %v356_v57 }
  0x6a   :  { %1004 = vmatpush3.bf16.msra.mxu1 %v1112_v10  ;;  %v1130_v10 = vld [vmem:[#allocation12] sm:$0xff]  }
  0x6b   :  { %1005 = vmatprep.subr.bf16.mxu1 %v1326_v0  ;;  %1020 = vmatpush3.bf16.msra.mxu0 %v1118_v16  ;;  %v232_v32 = vshrl.u32 %v231_v31, 16  ;;  %v358_v59 = vshrl.u32 %v357_v58, 16  ;;  %v477_v16 = vadd.s32 668265263, %v1469_v24 }
  0x6c   :  { %1021 = vmatprep.subr.bf16.mxu0 %v1326_v0 }
  0x6d   :  { %v233_v36 = vxor.u32 %v232_v32, %v231_v31  ;;  %v359_v63 = vxor.u32 %v358_v59, %v357_v58 }
  0x6e   :  { %1006 = vmatpush3.bf16.msra.mxu1 %v1113_v11  ;;  %v1131_v11 = vld [vmem:[#allocation13 + $0x38] sm:$0xff]  }
  0x6f   :  { %1007 = vmatprep.subr.bf16.mxu1 %v1326_v0  ;;  %1022 = vmatpush3.bf16.msra.mxu0 %v1119_v17  ;;  %vm234_vm2 = vcmp.lt.u32.totalorder %v233_v36, 3865470566  ;;  %vm360_vm4 = vcmp.lt.u32.totalorder %v359_v63, 3865470566  ;;  %v478_v17 = vshrl.u32 %v477_v16, 16  ;;  %v1136_v36 = vld [vmem:[#allocation13 + $0x10] sm:$0xff]  }
  0x70   :  { %1023 = vmatprep.subr.bf16.mxu0 %v1326_v0  ;;  %vm886_vm3 = vmpackc.low %vm234_vm2, %vm234_vm2  ;;  %v1144_v63 = vld [vmem:[#allocation15 + $0x10] sm:$0xff]  }
  0x71   :  { %vm898_vm5 = vmpackc.low %vm360_vm4, %vm360_vm4  ;;  %v479_v18 = vxor.u32 %v478_v17, %v477_v16 }
  0x72   :  { %1008 = vmatpush3.bf16.msra.mxu1 %v1114_v12  ;;  %v1132_v12 = vld [vmem:[#allocation13 + $0x30] sm:$0xff]  }
  0x73   :  { %1033 = vmatprep.subr.bf16.mxu1 %v1326_v0  ;;  %1024 = vmatpush3.bf16.msra.mxu0 %v1120_v44  ;;  %v480_v19 = vmul.u32 2146121005, %v479_v18  ;;  %v603_v44 = vadd.s32 374761393, %v1469_v24 }
  0x74   :  { %1025 = vmatprep.subr.bf16.mxu0 %v1326_v0 }
  0x75   :  { %v481_v20 = vshrl.u32 %v480_v19, 15 }
  0x77   :  { %1026 = vmatpush3.bf16.msra.mxu0 %v1121_v45  ;;  %v482_v21 = vxor.u32 %v481_v20, %v480_v19  ;;  %v604_v45 = vshrl.u32 %v603_v44, 16  ;;  %v925_v20 = vld [vmem:[%s1541_s13] ss:$0 sm:$0xff] }
  0x78   :  { %1027 = vmatprep.subr.bf16.mxu0 %v1326_v0 }
  0x79   :  { %v483_v22 = vmul.u32 2221713035, %v482_v21 }
  0x7b   :  { %1028 = vmatpush3.bf16.msra.mxu0 %v1122_v46  ;;  %v484_v23 = vshrl.u32 %v483_v22, 16  ;;  %v605_v46 = vxor.u32 %v604_v45, %v603_v44 }
  0x7c   :  { %1053 = vmatprep.subr.bf16.mxu0 %v1326_v0 }
  0x7d   :  { %v485_v28 = vxor.u32 %v484_v23, %v483_v22 }
  0x7f   :  { %vm486_vm6 = vcmp.lt.u32.totalorder %v485_v28, 3865470566 }
  0x80   :  { %vm910_vm7 = vmpackc.low %vm486_vm6, %vm486_vm6 }
 0x11d   :  { %v217_v34 = vpop.f32.mrf.mxu0 }
 0x11e   :  { %v218_v35 = vadd.f32 %v873_v33, %v217_v34 }
 0x11f   :  { %v991_v37 = vpop.f32.mrf.mxu0 }
 0x120   :  { %v223_v38 = vmul.f32 0.01, %v218_v35  ;;  %v1137_v37 = vld [vmem:[#allocation13 + $0x8] sm:$0xff]  }
 0x121   :  { %v220_v39 = vpop.f32.mrf.mxu0 }
 0x122   :  { %v224_v40 = vmax.f32 %v218_v35, %v223_v38  ;;  %v1138_v38 = vld [vmem:[#allocation13] sm:$0xff]   ;;  %v1139_v39 = vld [vmem:[#allocation15 + $0x38] sm:$0xff]  }
 0x123   :  { %v992_v41 = vpop.f32.mrf.mxu0 }
 0x124   :  { %v235_v42 = vmul.f32 1.1111112, %v224_v40  ;;  %v1140_v40 = vld [vmem:[#allocation15 + $0x30] sm:$0xff]   ;;  %v1141_v41 = vld [vmem:[#allocation15 + $0x28] sm:$0xff]  }
 0x126   :  { %v887_v43 = vpack.c.bf16 %v235_v42, %v235_v42  ;;  %v1142_v42 = vld [vmem:[#allocation15 + $0x20] sm:$0xff]  }
 0x128   :  { %1010 = vmatmul.mubr.msk.bf16.vlgmr.msra.gmra.mxu1 %vm886_vm3, %v887_v43  ;;  %v1143_v43 = vld [vmem:[#allocation15 + $0x18] sm:$0xff]  }
 0x129   :  { %1049 = vmatprep.mubr.msk.bf16.mxu1 %vm1327_vm0, %v1326_v0  ;;  %1034 = vmatpush3.bf16.msra.mxu1 %v1123_v47  ;;  %v606_v47 = vmul.u32 2146121005, %v605_v46 }
 0x12a   :  { %1035 = vmatprep.subr.bf16.mxu1 %v1326_v0 }
 0x12d   :  { %1036 = vmatpush3.bf16.msra.mxu1 %v1124_v48  ;;  %v607_v48 = vshrl.u32 %v606_v47, 15 }
 0x12e   :  { %1037 = vmatprep.subr.bf16.mxu1 %v1326_v0 }
 0x131   :  { %1038 = vmatpush3.bf16.msra.mxu1 %v1125_v49  ;;  %v608_v49 = vxor.u32 %v607_v48, %v606_v47 }
 0x132   :  { %1039 = vmatprep.subr.bf16.mxu1 %v1326_v0 }
 0x135   :  { %1040 = vmatpush3.bf16.msra.mxu1 %v1126_v50  ;;  %v609_v50 = vmul.u32 2221713035, %v608_v49 }
 0x136   :  { %1041 = vmatprep.subr.bf16.mxu1 %v1326_v0 }
 0x139   :  { %1042 = vmatpush3.bf16.msra.mxu1 %v1127_v51  ;;  %v610_v51 = vshrl.u32 %v609_v50, 16 }
 0x13a   :  { %1043 = vmatprep.subr.bf16.mxu1 %v1326_v0 }
 0x13b   :  { %v611_v55 = vxor.u32 %v610_v51, %v609_v50 }
 0x13d   :  { %1044 = vmatpush3.bf16.msra.mxu1 %v1128_v8  ;;  %vm612_vm8 = vcmp.lt.u32.totalorder %v611_v55, 3865470566 }
 0x13e   :  { %1045 = vmatprep.subr.bf16.mxu1 %v1326_v0  ;;  %vm922_vm9 = vmpackc.low %vm612_vm8, %vm612_vm8 }
 0x141   :  { %1046 = vmatpush3.bf16.msra.mxu1 %v1129_v9 }
 0x142   :  { %1047 = vmatprep.subr.bf16.mxu1 %v1326_v0 }
 0x145   :  { %1048 = vmatpush3.bf16.msra.mxu1 %v1130_v10 }
 0x146   :  { %1073 = vmatprep.subr.bf16.mxu1 %v1326_v0 }
 0x1e8   :  { %v343_v61 = vpop.f32.mrf.mxu1 }
 0x1e9   :  { %v344_v62 = vadd.f32 %v877_v60, %v343_v61 }
 0x1ea   :  { %v1011_v1 = vpop.f32.mrf.mxu1 }
 0x1eb   :  { %v349_v2 = vmul.f32 0.01, %v344_v62  ;;  %v1145_v1 = vld [vmem:[#allocation15 + $0x8] sm:$0xff]  }
 0x1ec   :  { %v346_v3 = vpop.f32.mrf.mxu1 }
 0x1ed   :  { %v350_v4 = vmax.f32 %v344_v62, %v349_v2  ;;  %v1146_v2 = vld [vmem:[#allocation15] sm:$0xff]   ;;  %v729_v3 = vadd.s32 2654435769, %v1469_v24 }
 0x1ee   :  { %v1012_v5 = vpop.f32.mrf.mxu1 }
 0x1ef   :  { %v361_v6 = vmul.f32 1.1111112, %v350_v4  ;;  %v730_v4 = vshrl.u32 %v729_v3, 16 }
 0x1f1   :  { %v899_v7 = vpack.c.bf16 %v361_v6, %v361_v6  ;;  %v731_v5 = vxor.u32 %v730_v4, %v729_v3 }
 0x1f3   :  { %1030 = vmatmul.mubr.msk.bf16.vlgmr.msra.gmra.mxu0 %vm898_vm5, %v899_v7  ;;  %v732_v6 = vmul.u32 2146121005, %v731_v5 }
 0x1f4   :  { %1069 = vmatprep.mubr.msk.bf16.mxu0 %vm1327_vm0, %v1326_v0  ;;  %1054 = vmatpush3.bf16.msra.mxu0 %v1131_v11  ;;  %v913_v11 = vld [vmem:[%s1539_s11] ss:$0 sm:$0xff]  ;;  %s861_s11 = sshll.u32 %s1328_s21, 4  ;;  %s862_s11 = int_to_ptr.vmem [resolvable:$true] %s861_s11 }
 0x1f5   :  { %1055 = vmatprep.subr.bf16.mxu0 %v1326_v0  ;;  %v733_v7 = vshrl.u32 %v732_v6, 15  ;;  %s1287_s10 = scalar_lea.vmem %s862_s11, 128  ;;  %p1292_p8 = scmp.lt.s32.totalorder %s862_s11, %s862_s11 }
 0x1f6   :  { %p1288_p7 = scmp.ne.s32.totalorder %s862_s11, %s1287_s10  ;;  %p1293_p9 = scmp.lt.s32.totalorder %s1287_s10, %s1287_s10 }
 0x1f7   :  { %v734_v8 = vxor.u32 %v733_v7, %v732_v6 }
 0x1f8   :  { %1056 = vmatpush3.bf16.msra.mxu0 %v1132_v12  ;;  %p1294_p10 = por %p1293_p9, %p1292_p8 }
 0x1f9   :  { %1057 = vmatprep.subr.bf16.mxu0 %v1326_v0  ;;  %v735_v9 = vmul.u32 2221713035, %v734_v8 }
 0x1fa   :  { %p1295_p11 = pnand %p1294_p10, %p1288_p7 }
 0x1fb   :  { %v736_v10 = vshrl.u32 %v735_v9, 16 }
 0x1fc   :  { %1058 = vmatpush3.bf16.msra.mxu0 %v1133_v13 }
 0x1fd   :  { %1059 = vmatprep.subr.bf16.mxu0 %v1326_v0 }
 0x200   :  { %1060 = vmatpush3.bf16.msra.mxu0 %v1134_v14  ;;  %v737_v14 = vxor.u32 %v736_v10, %v735_v9 }
 0x201   :  { %1061 = vmatprep.subr.bf16.mxu0 %v1326_v0 }
 0x202   :  { %vm738_vm10 = vcmp.lt.u32.totalorder %v737_v14, 3865470566 }
 0x203   :  { %vm934_vm11 = vmpackc.low %vm738_vm10, %vm738_vm10 }
 0x204   :  { %1062 = vmatpush3.bf16.msra.mxu0 %v1135_v15 }
 0x205   :  { %1063 = vmatprep.subr.bf16.mxu0 %v1326_v0 }
 0x208   :  { %1064 = vmatpush3.bf16.msra.mxu0 %v1136_v36 }
 0x209   :  { %1065 = vmatprep.subr.bf16.mxu0 %v1326_v0 }
 0x20c   :  { %1066 = vmatpush3.bf16.msra.mxu0 %v1137_v37 }
 0x20d   :  { %1067 = vmatprep.subr.bf16.mxu0 %v1326_v0 }
 0x210   :  { %1068 = vmatpush3.bf16.msra.mxu0 %v1138_v38 }
 0x2b3   :  { %v469_v26 = vpop.f32.mrf.mxu0 }
 0x2b4   :  { %v470_v27 = vadd.f32 %v889_v25, %v469_v26 }
 0x2b5   :  { %v1031_v29 = vpop.f32.mrf.mxu0 }
 0x2b6   :  { %v475_v30 = vmul.f32 0.01, %v470_v27 }
 0x2b7   :  { %v472_v31 = vpop.f32.mrf.mxu0 }
 0x2b8   :  { %v476_v32 = vmax.f32 %v470_v27, %v475_v30 }
 0x2b9   :  { %v1032_v33 = vpop.f32.mrf.mxu0 }
 0x2ba   :  { %v487_v34 = vmul.f32 1.1111112, %v476_v32 }
 0x2bc   :  { %v911_v35 = vpack.c.bf16 %v487_v34, %v487_v34 }
 0x2be   :  { %1050 = vmatmul.mubr.msk.bf16.vlgmr.msra.gmra.mxu1 %vm910_vm7, %v911_v35 }
 0x2bf   :  { %1089 = vmatprep.mubr.msk.bf16.mxu1 %vm1327_vm0, %v1326_v0  ;;  %1074 = vmatpush3.bf16.msra.mxu1 %v1139_v39 }
 0x2c0   :  { %1075 = vmatprep.subr.bf16.mxu1 %v1326_v0 }
 0x2c3   :  { %1076 = vmatpush3.bf16.msra.mxu1 %v1140_v40 }
 0x2c4   :  { %1077 = vmatprep.subr.bf16.mxu1 %v1326_v0 }
 0x2c7   :  { %1078 = vmatpush3.bf16.msra.mxu1 %v1141_v41 }
 0x2c8   :  { %1079 = vmatprep.subr.bf16.mxu1 %v1326_v0 }
 0x2cb   :  { %1080 = vmatpush3.bf16.msra.mxu1 %v1142_v42 }
 0x2cc   :  { %1081 = vmatprep.subr.bf16.mxu1 %v1326_v0 }
 0x2cf   :  { %1082 = vmatpush3.bf16.msra.mxu1 %v1143_v43 }
 0x2d0   :  { %1083 = vmatprep.subr.bf16.mxu1 %v1326_v0 }
 0x2d3   :  { %1084 = vmatpush3.bf16.msra.mxu1 %v1144_v63 }
 0x2d4   :  { %1085 = vmatprep.subr.bf16.mxu1 %v1326_v0 }
 0x2d7   :  { %1086 = vmatpush3.bf16.msra.mxu1 %v1145_v1 }
 0x2d8   :  { %1087 = vmatprep.subr.bf16.mxu1 %v1326_v0 }
 0x2db   :  { %1088 = vmatpush3.bf16.msra.mxu1 %v1146_v2 }
 0x37e   :  { %v595_v53 = vpop.f32.mrf.mxu1 }
 0x37f   :  { %v596_v54 = vadd.f32 %v901_v52, %v595_v53 }
 0x380   :  { %v1051_v56 = vpop.f32.mrf.mxu1 }
 0x381   :  { %v601_v57 = vmul.f32 0.01, %v596_v54 }
 0x382   :  { %v598_v58 = vpop.f32.mrf.mxu1 }
 0x383   :  { %v602_v59 = vmax.f32 %v596_v54, %v601_v57 }
 0x384   :  { %v1052_v60 = vpop.f32.mrf.mxu1 }
 0x385   :  { %v613_v61 = vmul.f32 1.1111112, %v602_v59 }
 0x387   :  { %v923_v62 = vpack.c.bf16 %v613_v61, %v613_v61 }
 0x389   :  { %1070 = vmatmul.mubr.msk.bf16.vlgmr.msra.gmra.mxu0 %vm922_vm9, %v923_v62 }
 0x449   :  { %v721_v12 = vpop.f32.mrf.mxu0 }
 0x44a   :  { %v722_v13 = vadd.f32 %v913_v11, %v721_v12 }
 0x44b   :  { %v1071_v15 = vpop.f32.mrf.mxu0 }
 0x44c   :  { %v727_v0 = vmul.f32 0.01, %v722_v13 }
 0x44d   :  { %v724_v16 = vpop.f32.mrf.mxu0 }
 0x44e   :  { %v728_v17 = vmax.f32 %v722_v13, %v727_v0 }
 0x44f   :  { %v1072_v24 = vpop.f32.mrf.mxu0 }
 0x450   :  { %v739_v18 = vmul.f32 1.1111112, %v728_v17 }
 0x452   :  { %v935_v19 = vpack.c.bf16 %v739_v18, %v739_v18 }
 0x454   :  { %1090 = vmatmul.mubr.msk.bf16.vlgmr.msra.gmra.mxu1 %vm934_vm11, %v935_v19 }
 0x514   :  { %v847_v21 = vpop.f32.mrf.mxu1 }
 0x515   :  { %v848_v22 = vadd.f32 %v925_v20, %v847_v21 }
 0x516   :  { %v1091_v23 = vpop.f32.mrf.mxu1 }
 0x517   :  { %v853_v25 = vmax.f32 %v848_v22, 0.0 }
 0x518   :  { %v850_v26 = vpop.f32.mrf.mxu1 }
 0x519   :  { %854 = vst [vmem:[#allocation16] sm:$0xff] %v853_v25 }
 0x51a   :  { %v1092_v27 = vpop.f32.mrf.mxu1 }
 0x51b   :  { %1298 = shalt.err (!%p1295_p11)
}
 0x51c   :  { %864 = dma.vmem_to_hbm [thread:$0]  %s862_s11, 128, %s1542_s14, [#allocation6]  }
 0x51d   :  { %1315 = dma.done.wait [#allocation6], 128  }
 0x51e   :  { %1316 = vsyncadd [#allocation6], 4294967168 }
 0x51f   :  { %868 = vsyncpa [#allocation5], 1 }
 0x520   :  { %869 = vsyncpa [#allocation8], 1 }
 0x521   :  { %870 = vsyncpa [#allocation11], 1 }
 0x522   :  { %871 = vsyncpa [#allocation14], 1 }
 0x523   :  { %872 = vsyncpa [#allocation6], 1 }

</bundles_post_ra>
